<compile_context>
chip_gen: v6e
topology: v6e:2x2x1
jax: 0.10.0
libtpu: 0.0.40
codegen_flags: <defaults>
</compile_context>

<pallas_src>
import jax
import jax.numpy as jnp
from jax import lax
from jax.experimental import pallas as pl
from jax.experimental.pallas import tpu as pltpu

# Scharr filter taps (frozen, requires_grad=False in the torch module).
_GX = ((3.0, 0.0, -3.0),
       (10.0, 0.0, -10.0),
       (3.0, 0.0, -3.0))
_GY = ((3.0, 10.0, 3.0),
       (0.0, 0.0, 0.0),
       (-3.0, -10.0, -3.0))

_SLAB = 256               # rows per in-kernel slab when H is large (bounds live temporaries)
_TEN_THIRDS = 10.0 / 3.0  # [3,10,3] applied as (a + c) + (10/3)*b; a single *9 folded at the end


def _scharr_sq(x):
    """(nb, R, W) native-dtype rows -> (nb, R-2, W-2) f32 sum of squared Scharr gradients.

    Separable Scharr:  Gx = [3,10,3]^T (x) [1,0,-1],  Gy = [1,0,-1]^T (x) [3,10,3].
    Both [3,10,3] applications are computed scaled by 1/3 and the *9 is folded into the
    final squared sum.
    """
    R, W = x.shape[1], x.shape[2]
    # Horizontal pass: lane-shifted slices in the native dtype (cheaper for bf16/uint8),
    # upcast to f32 only for the arithmetic.
    x0 = x[:, :, 0:W - 2].astype(jnp.float32)
    x1 = x[:, :, 1:W - 1].astype(jnp.float32)
    x2 = x[:, :, 2:W].astype(jnp.float32)
    cx = x0 - x2                              # [1, 0, -1]    -> feeds Gx
    cy = (x0 + x2) + _TEN_THIRDS * x1         # [1, 10/3, 1]  -> feeds Gy (scaled by 1/3)
    # Vertical pass: static sublane-shifted slices.
    gx = (cx[:, 0:R - 2] + cx[:, 2:R]) + _TEN_THIRDS * cx[:, 1:R - 1]   # Gx / 3
    gy = cy[:, 0:R - 2] - cy[:, 2:R]                                     # Gy / 3
    return 9.0 * (gx * gx + gy * gy)


def _pseudo_sobel_kernel(x_ref, o_ref):
    # x_ref: (nb, H, W) input block.  o_ref: (nb, H-2, W-2) output block.
    Ho = o_ref.shape[1]                       # == H - 2 (static)
    if Ho <= _SLAB:
        # Small/medium images: one fused expression over the whole block.
        o_ref[...] = _scharr_sq(x_ref[...]).astype(o_ref.dtype)
    else:
        # Large images: loop over row slabs (2-row halo re-read from the VMEM block;
        # the clamped last slab recomputes a few rows) to bound live f32 temporaries.
        n_slabs = pl.cdiv(Ho, _SLAB)

        def body(s, carry):
            r0 = jnp.minimum(s * _SLAB, Ho - _SLAB)
            xs = x_ref[:, pl.ds(r0, _SLAB + 2), :]
            o_ref[:, pl.ds(r0, _SLAB), :] = _scharr_sq(xs).astype(o_ref.dtype)
            return carry

        lax.fori_loop(0, n_slabs, body, 0)


def _vmem_capacity_bytes():
    try:
        cap = getattr(pltpu.get_tpu_info(), "vmem_capacity_bytes", None)
        if cap:
            return int(cap)
    except Exception:
        pass
    return 64 * 1024 * 1024   # conservative fallback: v7x per-TensorCore VMEM


def _vmem_tile_bytes(rows, cols, itemsize):
    # VMEM blocks are laid out in (8, 128) tiles: sublanes pad to 8, lanes pad to 128
    # (sub-32-bit sublane packing ignored -> slightly conservative estimate).
    return (-(-rows // 8) * 8) * (-(-cols // 128) * 128) * itemsize


def _pick_batch_block(n, per_image_bytes, budget_bytes):
    """Images per grid step.  Sized so double-buffered IO + live temporaries fit the
    VMEM budget; prefers >=2 (and an even number of) grid steps so v7x's two
    TensorCores both get work.  The grid uses cdiv, so nb need not divide n."""
    cap = max(1, min(n, budget_bytes // max(per_image_bytes, 1)))
    if n == 1:
        return 1
    steps = max(-(-n // cap), 2)          # smallest step count the budget allows, >= 2
    if steps % 2:
        steps += 1                        # prefer an even number of grid steps (v7x)
    nb = -(-n // steps)
    for cand in range(nb, max(nb - 4, 1) - 1, -1):   # nudge toward an even realized grid
        if (-(-n // cand)) % 2 == 0:
            return cand
    return nb


def pseudo_sobel(img):
    """img: (N, 1, H, W) -> (N, 1, H-2, W-2)  (PseudoSobel forward)."""
    assert img.ndim == 4 and img.shape[1] == 1, img.shape
    N, _, H, W = img.shape
    assert H >= 3 and W >= 3, (H, W)

    out_dtype = img.dtype if jnp.issubdtype(img.dtype, jnp.floating) else jnp.float32

    # Size-1 channel squeeze / unsqueeze are metadata-only (no extra HBM pass).
    x = img.reshape(N, H, W)

    vmem_cap = _vmem_capacity_bytes()
    in_isz = jnp.dtype(x.dtype).itemsize
    out_isz = jnp.dtype(out_dtype).itemsize
    tmp_rows = min(H, _SLAB + 2)
    per_image = (2 * _vmem_tile_bytes(H, W, in_isz)              # input block, double-buffered
                 + 2 * _vmem_tile_bytes(H - 2, W - 2, out_isz)   # output block, double-buffered
                 + 6 * _vmem_tile_bytes(tmp_rows, W, 4))         # live f32 temporaries
    budget = (vmem_cap * 5) // 8          # ~40 MiB on v7x (64 MiB VMEM), ~80 MiB on v5e/v6e
    # TODO(synk): a single image whose double-buffered IO alone exceeds `budget`
    # (e.g. 4K float32 frames on v7x) still needs halo'd row-slab tiling over H /
    # manual DMA; not implemented here.
    nb = _pick_batch_block(N, per_image, budget)
    grid = (pl.cdiv(N, nb),)              # ragged last batch block is masked by Pallas

    out = pl.pallas_call(
        _pseudo_sobel_kernel,
        out_shape=jax.ShapeDtypeStruct((N, H - 2, W - 2), out_dtype),
        grid_spec=pltpu.PrefetchScalarGridSpec(
            num_scalar_prefetch=0,
            grid=grid,
            in_specs=[pl.BlockSpec((nb, H, W), lambda n: (n, 0, 0))],
            out_specs=pl.BlockSpec((nb, H - 2, W - 2), lambda n: (n, 0, 0)),
        ),
        compiler_params=pltpu.CompilerParams(
            dimension_semantics=("parallel",),
            vmem_limit_bytes=(vmem_cap * 3) // 4,
        ),
    )(x)

    return out.reshape(N, 1, H - 2, W - 2)


def _reference(img):
    # Independent JAX reference using lax.conv (cross-correlation, NCHW / OIHW).
    G = jnp.stack([jnp.array(_GX, jnp.float32), jnp.array(_GY, jnp.float32)])
    G = G[:, None, :, :]                              # (2, 1, 3, 3)
    y = lax.conv_general_dilated(
        img.astype(jnp.float32), G,
        window_strides=(1, 1), padding="VALID",
        dimension_numbers=("NCHW", "OIHW", "NCHW"))
    return jnp.sum(y * y, axis=1, keepdims=True)


if __name__ == "__main__":
    key = jax.random.PRNGKey(0)
    # Shapes implied by Conv2d(in_channels=1, ...): NCHW with C=1.
    img = jax.random.uniform(key, (2, 1, 16, 16), dtype=jnp.float32)
    out = jax.block_until_ready(pseudo_sobel(img))
    ref = _reference(img)
    assert out.shape == (2, 1, 14, 14), out.shape
    assert jnp.allclose(out, ref, rtol=1e-5, atol=1e-3), float(jnp.max(jnp.abs(out - ref)))

    # Second check: odd batch (ragged last block) and non-(8,128)-aligned spatial dims.
    img2 = jax.random.uniform(jax.random.PRNGKey(1), (3, 1, 17, 19), dtype=jnp.float32)
    out2 = jax.block_until_ready(pseudo_sobel(img2))
    ref2 = _reference(img2)
    assert out2.shape == (3, 1, 15, 17), out2.shape
    assert jnp.allclose(out2, ref2, rtol=1e-5, atol=1e-3), float(jnp.max(jnp.abs(out2 - ref2)))

    print("KERNEL_OK")
</pallas_src>

<mosaic_0001>
module attributes {stable_mosaic.version = 11 : i64} {
  func.func @_pseudo_sobel_kernel(%arg0: i32, %arg1: memref<1x16x16xf32, #tpu.memory_space<vmem>>, %arg2: memref<1x14x14xf32, #tpu.memory_space<vmem>>) attributes {dimension_semantics = [#tpu.dimension_semantics<parallel>], iteration_bounds = array<i64: 2>, scalar_prefetch = 0 : i64, scratch_operands = 0 : i64, tpu.core_type = #tpu.core_type<tc>, window_params = [{transform_indices = @transform_0, window_bounds = array<i64: 1, 16, 16>}, {transform_indices = @transform_1, window_bounds = array<i64: 1, 14, 14>}]} {
    %c0 = arith.constant 0 : index
    %c0_0 = arith.constant 0 : index
    %c0_1 = arith.constant 0 : index
    %0 = vector.load %arg1[%c0, %c0_0, %c0_1] : memref<1x16x16xf32, #tpu.memory_space<vmem>>, vector<1x16x16xf32>
    %1 = vector.extract_strided_slice %0 {offsets = [0, 0, 0], sizes = [1, 16, 14], strides = [1, 1, 1]} : vector<1x16x16xf32> to vector<1x16x14xf32>
    %2 = vector.extract_strided_slice %0 {offsets = [0, 0, 1], sizes = [1, 16, 14], strides = [1, 1, 1]} : vector<1x16x16xf32> to vector<1x16x14xf32>
    %3 = vector.extract_strided_slice %0 {offsets = [0, 0, 2], sizes = [1, 16, 14], strides = [1, 1, 1]} : vector<1x16x16xf32> to vector<1x16x14xf32>
    %4 = arith.subf %1, %3 : vector<1x16x14xf32>
    %5 = arith.addf %1, %3 : vector<1x16x14xf32>
    %cst = arith.constant 3.33333325 : f32
    %6 = vector.broadcast %cst : f32 to vector<1x16x14xf32>
    %7 = arith.mulf %6, %2 : vector<1x16x14xf32>
    %8 = arith.addf %5, %7 : vector<1x16x14xf32>
    %9 = vector.extract_strided_slice %4 {offsets = [0, 0, 0], sizes = [1, 14, 14], strides = [1, 1, 1]} : vector<1x16x14xf32> to vector<1x14x14xf32>
    %10 = vector.extract_strided_slice %4 {offsets = [0, 2, 0], sizes = [1, 14, 14], strides = [1, 1, 1]} : vector<1x16x14xf32> to vector<1x14x14xf32>
    %11 = arith.addf %9, %10 : vector<1x14x14xf32>
    %12 = vector.extract_strided_slice %4 {offsets = [0, 1, 0], sizes = [1, 14, 14], strides = [1, 1, 1]} : vector<1x16x14xf32> to vector<1x14x14xf32>
    %cst_2 = arith.constant 3.33333325 : f32
    %13 = vector.broadcast %cst_2 : f32 to vector<1x14x14xf32>
    %14 = arith.mulf %13, %12 : vector<1x14x14xf32>
    %15 = arith.addf %11, %14 : vector<1x14x14xf32>
    %16 = vector.extract_strided_slice %8 {offsets = [0, 0, 0], sizes = [1, 14, 14], strides = [1, 1, 1]} : vector<1x16x14xf32> to vector<1x14x14xf32>
    %17 = vector.extract_strided_slice %8 {offsets = [0, 2, 0], sizes = [1, 14, 14], strides = [1, 1, 1]} : vector<1x16x14xf32> to vector<1x14x14xf32>
    %18 = arith.subf %16, %17 : vector<1x14x14xf32>
    %19 = arith.mulf %15, %15 : vector<1x14x14xf32>
    %20 = arith.mulf %18, %18 : vector<1x14x14xf32>
    %21 = arith.addf %19, %20 : vector<1x14x14xf32>
    %cst_3 = arith.constant 9.000000e+00 : f32
    %22 = vector.broadcast %cst_3 : f32 to vector<1x14x14xf32>
    %23 = arith.mulf %22, %21 : vector<1x14x14xf32>
    %c0_4 = arith.constant 0 : index
    %c0_5 = arith.constant 0 : index
    %c0_6 = arith.constant 0 : index
    %24 = vector.load %arg2[%c0_4, %c0_5, %c0_6] : memref<1x14x14xf32, #tpu.memory_space<vmem>>, vector<1x14x14xf32>
    tpu.vector_store %arg2[%c0_4, %c0_5, %c0_6], %23 {strides = array<i32>} : memref<1x14x14xf32, #tpu.memory_space<vmem>>, vector<1x14x14xf32>,
    return
  }
  func.func @transform_0(%arg0: i32) -> (i32, i32, i32) {
    %c0_i32 = arith.constant 0 : i32
    %c0_i32_0 = arith.constant 0 : i32
    %c0_i32_1 = arith.constant 0 : i32
    return %arg0, %c0_i32, %c0_i32_0 : i32, i32, i32
  }
  func.func @transform_1(%arg0: i32) -> (i32, i32, i32) {
    %c0_i32 = arith.constant 0 : i32
    %c0_i32_0 = arith.constant 0 : i32
    %c0_i32_1 = arith.constant 0 : i32
    return %arg0, %c0_i32, %c0_i32_0 : i32, i32, i32
  }
}

</mosaic_0001>

<bundles_post_ra>
// kernel: tpu_custom_call.1
= control target key start
LH: loop header
LB: loop body
LE: loop exit
PB: predicated region body
PF: predicated region fallthrough
CT: control target
= control target key end

     0   :  { %6 = vsyncpa [#allocation3], 0  ;;  %s512_s0 = inlined_call_operand.hbm [shape: f32[2,16,16], index: 0, kind: input, shape index: {}]   ;;  %s513_s1 = inlined_call_operand.vmem [shape: f32[2,14,14], index: 1, kind: output, shape index: {}]  }
   0x1   :  { %8 = vsyncpa [#allocation3 + $0x1], 0  ;;  %s409_s6 = smov 0   ;;  %s411_s7 = smov 0  }
   0x2   :  { %s413_s8 = smov 0   ;;  %s415_s9 = smov 0  }
   0x3 LB: > { %s428_s10 = sadd.s32 4294967295, %s392_s9   ;;  %s431_s11 = sadd.s32 1, %s392_s9   ;;  %s392_s9 = sphi %s415_s9, %s522_s9   ;;  %s388_s8 = sphi %s413_s8, %s521_s8   ;;  %s384_s7 = sphi %s411_s7, %s520_s7   ;;  %s380_s6 = sphi %s409_s6, %s519_s6  }
   0x4   : > { %s18_s12 = ssub.s32 %s392_s9, %s431_s11  ;;  %s21_s13 = sadd.s32 1, %s388_s8 }
   0x5   : > { %p19_p0 = scmp.eq.s32.totalorder %s18_s12, 0  ;;  %p28_p1 = scmp.ne.s32.totalorder %s388_s8, %s384_s7 }
   0x6   : > { %p29_p2 = scmp.eq.s32.totalorder %s392_s9, 0  ;;  %p34_p3 = scmp.ne.s32.totalorder %s384_s7, %s380_s6 }
   0x7   : > { %s441_s14 = scalar_select %p19_p0, %s388_s8, %s21_s13  }
   0x8   : > { %p30_p4 = por %p29_p2, %p28_p1  ;;  %p35_p5 = scmp.eq.s32.totalorder %s428_s10, 0 }
   0x9   : > { %p293_p6 = scmp.lt.s32.totalorder %s392_s9, 2  ;;  %s84_s16 = sand.u32 1, %s388_s8  }
   0xa   : > { %p445_p7 = por %p35_p5, %p34_p3  ;;  %s276_s17 = sshll.u32 %s84_s16, 4 }
   0xb   : > { %s285_s18 = sshll.u32 %s392_s9, 8  ;;  %s88_s22 = scalar_lea.vmem [#allocation2], %s276_s17 }
   0xc   : > { %s515_s15 = scalar_select %p445_p7, 1, 0 }
   0xd   : > { %s454_s21 = scalar_lea.hbm %s512_s0, %s285_s18  ;;  %s95_s23 = sshll.u32 %s88_s22, 4  ;;  %s456_s23 = int_to_ptr.vmem [resolvable:$true] %s95_s23 }
   0xe   : > { %p458_p8 = pnand %p293_p6, %p30_p4  ;;  %s463_s25 = scalar_lea.sflag [#allocation3], %s84_s16 }
   0xf   : > { %s330_s26 = scalar_lea.hbm %s454_s21, 256  ;;  %s335_s29 = scalar_lea.hbm %s512_s0, 512 }
  0x10   : > { %p331_p10 = scmp.ne.s32.totalorder %s454_s21, %s330_s26  ;;  %p332_p11 = pneg %p458_p8 }
  0x11   : > { %p336_p0 = scmp.lt.s32.totalorder %s454_s21, %s512_s0  ;;  %p337_p1 = scmp.lt.s32.totalorder %s335_s29, %s330_s26 }
  0x12   : > { %p333_p12 = pnand %p332_p11, %p331_p10 }
  0x13   : > { %p338_p2 = por %p337_p1, %p336_p0 }
  0x14   : > { %p334_p13 = pneg %p333_p12 }
  0x16   : > { %p339_p3 = pnand %p338_p2, %p334_p13 }
  0x18   : > { %342 = shalt.err (!%p339_p3)
}
  0x19   : > { %s343_s3 = scalar_lea.vmem %s456_s23, 256  ;;  %s394_s4 = smov [#allocation2]  }
  0x1a   : > { %p344_p4 = scmp.ne.s32.totalorder %s456_s23, %s343_s3  ;;  %s348_s5 = sshll.u32 %s394_s4, 4  ;;  %s349_s5 = int_to_ptr.vmem [resolvable:$false] %s348_s5 }
  0x1b   : > { %s350_s6 = scalar_lea.vmem %s349_s5, 512  ;;  %p351_p10 = scmp.lt.s32.totalorder %s456_s23, %s349_s5 }
  0x1c   : > { %p346_p5 = pnand %p344_p4, %p332_p11  ;;  %p352_p12 = scmp.lt.s32.totalorder %s350_s6, %s343_s3 }
  0x1e   : > { %p347_p6 = pneg %p346_p5  ;;  %p353_p9 = por %p352_p12, %p351_p10 }
  0x20   : > { %p354_p7 = pnand %p353_p9, %p347_p6 }
  0x22   : > { %357 = shalt.err (!%p354_p7)
}
  0x23   : > { %s395_s12 = smov 128   ;;  %s396_s13 = smov 8  }
  0x24   : > { %292 = dma.hbm_to_vmem [thread:$0]  (!%p458_p8), %s454_s21, 256, %s456_s23, %s463_s25, %s395_s12, %s395_s12, %s396_s13  }
  0x25   : > { %p103_p11 = scmp.lt.s32.totalorder %s392_s9, 3  ;;  %p517_p13 = scmp.ge.s32.totalorder %s392_s9, 1 }
  0x27   : > { %p104_p0 = pnand %p517_p13, %p103_p11 }
  0x28   : > { %s109_s16 = sand.u32 (!%p104_p0), 1, %s384_s7   ;;  %p518_p7 = scmp.ne.s32.totalorder (!%p104_p0), %s515_s15, 0 }
  0x29   : > { %107 = sbr.rel (%p104_p0) target bundleno = 183 (0xb7), region = 24  ;;  %s280_s17 = sshll.u32 (!%p104_p0), %s109_s16, 4 }
  0x2a   : > { %s110_s18 = scalar_lea.sflag (!%p104_p0), [#allocation3], %s109_s16  ;;  %s113_s19 = scalar_lea.vmem (!%p104_p0), [#allocation2], %s280_s17 }
  0x2e   : > { %375 = dma.done.wait (%p518_p7), %s110_s18, 256  }
  0x2f   : > { %377 = vsyncadd (%p518_p7), %s110_s18, 4294967040  ;;  %v137_v0 = vld [vmem:[%s113_s19] sm:$0xff]  ;;  %v138_v1 = vld [vmem:[%s113_s19 + $0x8] sm:$0xff]  ;;  %s397_s20 = smov 126   ;;  %s398_s9 = smov 127   ;;  %vm165_vm0 = vcmask 1045504  }
  0x30   : > { %141 = vrot.lane.b32.xlu0 %v137_v0, %s397_s20  ;;  %v151_v2 = vmul.f32 3.3333333, %v137_v0  ;;  %v152_v3 = vmul.f32 3.3333333, %v138_v1  ;;  %p132_p8 = scmp.lt.s32.totalorder %s428_s10, 1  ;;  %vm177_vm1 = vcmask 1046528  }
  0x31   : > { %vm204_vm2 = vcmask 111616   ;;  %vm202_vm3 = vcmask 113664  }
  0x32   : > { %155 = vrot.lane.b32.xlu1 %v151_v2, %s398_s9  ;;  %s524_s10 = smov (!%p132_p8, %s428_s10), 1 }
  0x33   : > { %s286_s15 = sshll.u32 %s524_s10, 4 }
  0x34   : > { %143 = vrot.lane.b32.xlu0 %v138_v1, %s397_s20  ;;  %s136_s23 = scalar_lea.vmem %s513_s1, %s286_s15 }
  0x36   : > { %157 = vrot.lane.b32.xlu1 %v152_v3, %s398_s9 }
  0xa2   : > { %v142_v4 = vpop.permute.xlu0 %141 }
  0xa3   : > { %v147_v5 = vsub.f32 %v137_v0, %v142_v4  ;;  %v149_v6 = vadd.f32 %v142_v4, %v137_v0 }
  0xa4   : > { %v156_v7 = vpop.permute.xlu1 %155 }
  0xa5   : > { %v173_v8 = vmul.f32 3.3333333, %v147_v5  ;;  %v161_v9 = vadd.f32 %v156_v7, %v149_v6  ;;  %v166_v14 = vrot.slane %v147_v5, 2 }
  0xa6   : > { %v144_v10 = vpop.permute.xlu0 %143 }
  0xa7   : > { %v148_v11 = vsub.f32 %v138_v1, %v144_v10  ;;  %v150_v12 = vadd.f32 %v144_v10, %v138_v1  ;;  %v178_v18 = vrot.slane %v173_v8, 1  ;;  %v187_v19 = vrot.slane %v161_v9, 2 }
  0xa8   : > { %v158_v13 = vpop.permute.xlu1 %157 }
  0xa9   : > { %v167_v15 = vrot.slane %v148_v11, 2  ;;  %v174_v16 = vmul.f32 3.3333333, %v148_v11  ;;  %v162_v17 = vadd.f32 %v158_v13, %v150_v12 }
  0xab   : > { %v172_v20 = vadd.f32 %v167_v15, %v148_v11  ;;  %v179_v21 = vrot.slane %v174_v16, 1  ;;  %v168_v22 = vsel %vm165_vm0, %v166_v14, %v167_v15  ;;  %v188_v23 = vrot.slane %v162_v17, 2 }
  0xac   : > { %v171_v24 = vadd.f32 %v168_v22, %v147_v5 }
  0xad   : > { %v180_v25 = vsel %vm177_vm1, %v178_v18, %v179_v21  ;;  %v184_v26 = vadd.f32 %v179_v21, %v172_v20  ;;  %v189_v27 = vsel %vm165_vm0, %v187_v19, %v188_v23  ;;  %v193_v28 = vsub.f32 %v162_v17, %v188_v23 }
  0xae   : > { %v183_v29 = vadd.f32 %v180_v25, %v171_v24  ;;  %v192_v30 = vsub.f32 %v161_v9, %v189_v27 }
  0xaf   : > { %v195_v31 = vmul.f32 %v184_v26, %v184_v26  ;;  %v197_v32 = vmul.f32 %v193_v28, %v193_v28 }
  0xb0   : > { %v194_v33 = vmul.f32 %v183_v29, %v183_v29  ;;  %v196_v34 = vmul.f32 %v192_v30, %v192_v30 }
  0xb1   : > { %v199_v35 = vadd.f32 %v197_v32, %v195_v31 }
  0xb2   : > { %v198_v36 = vadd.f32 %v196_v34, %v194_v33 }
  0xb3   : > { %v201_v37 = vmul.f32 9.0, %v199_v35 }
  0xb4   : > { %v200_v38 = vmul.f32 9.0, %v198_v36 }
  0xb5   : > { %205 = vst.msk [vmem:[%s136_s23 + $0x8] sm:$0x3f] %vm204_vm2, %v201_v37 }
  0xb6   : > { %203 = vst.msk [vmem:[%s136_s23] sm:$0xff] %vm202_vm3, %v200_v38 }
  0xb7 PF: > { %p11_p9 = scmp.ge.s32.totalorder %s431_s11, 4   ;;  %s519_s6 = smov %s384_s7 }
  0xb8   : > { %s520_s7 = smov %s388_s8  ;;  %s521_s8 = smov %s441_s14 }
  0xb9   : > { %s522_s9 = smov %s431_s11  ;;  %13 = sbr.rel (!%p11_p9) target bundleno = 3 (0x3), region = 64 }
  0xbe   :  { %227 = vsyncpa [#allocation3], 1 }
  0xbf   :  { %229 = vsyncpa [#allocation3 + $0x1], 1 }

</bundles_post_ra>
